<compile_context>
chip_gen: v6e
topology: v6e:2x2x1
jax: 0.10.0
libtpu: 0.0.40
codegen_flags: <defaults>
</compile_context>

<pallas_src>
import math

import jax
import jax.numpy as jnp
from jax.experimental import pallas as pl
from jax.experimental.pallas import tpu as pltpu


def _gelu_tanh(x):
    # Matches nn.GELU(approximate='tanh'); PyTorch's default nn.GELU() is the
    # exact erf form (difference < ~1e-3).
    # TODO(synk): switch to exact erf GELU once erf lowering on Mosaic is guaranteed.
    c = math.sqrt(2.0 / math.pi)
    return 0.5 * x * (1.0 + jnp.tanh(c * (x + 0.044715 * x * x * x)))


def _make_ffn_kernel(elem_dtype):
    """Kernel over grid (row_tiles, hidden_tiles); the hidden axis is a reduction."""

    def kernel(x_ref, w1_ref, b1_ref, w2_ref, b2_ref, o_ref, acc_ref):
        k = pl.program_id(1)

        @pl.when(k == 0)
        def _init():
            acc_ref[...] = jnp.zeros_like(acc_ref)

        # Linear1 tile (MXU, f32 accumulation) + bias + GELU, fully in VMEM.
        h = jnp.dot(x_ref[...], w1_ref[...], preferred_element_type=jnp.float32)
        h = h.astype(elem_dtype) + b1_ref[...].astype(elem_dtype)
        h = _gelu_tanh(h)

        # Linear2 tile: accumulate into the f32 scratch; bf16 stays bf16 on MXU.
        acc_ref[...] += jnp.dot(h.astype(w2_ref.dtype), w2_ref[...],
                                preferred_element_type=jnp.float32)

        @pl.when(k == pl.num_programs(1) - 1)
        def _finalize():
            o_ref[...] = (acc_ref[...]
                          + b2_ref[...].astype(jnp.float32)).astype(o_ref.dtype)

    return kernel


def _round_up(x, mult):
    return ((x + mult - 1) // mult) * mult


def _vmem_capacity_bytes():
    try:
        return int(pltpu.get_tpu_info().vmem_capacity_bytes)
    except Exception:
        return 64 * 1024 * 1024  # conservative fallback (v7x per-core VMEM)


def _vmem_estimate(tm, th, hidden, d_in, d_out, act_bytes, w_bytes):
    w_bufs = 1 if th == hidden else 2          # resident weights -> single copy
    est = 2 * tm * d_in * act_bytes            # x tile, double-buffered
    est += 2 * tm * d_out * act_bytes          # out tile, double-buffered
    est += w_bufs * ((d_in + d_out) * th + th) * w_bytes   # w1, w2, b1
    est += d_out * w_bytes                     # b2 (always resident)
    est += tm * d_out * 4                      # f32 accumulator scratch
    est += tm * th * (4 + w_bytes)             # f32 hidden + cast temporary
    return int(est * 1.15) + (2 << 20)         # fudge for Mosaic internals


def _select_tiles(m, d_in, hidden, d_out, act_bytes, w_bytes, budget):
    """Pick (row_tile, hidden_tile) that fits the VMEM budget, biggest first."""
    m8 = max(8, _round_up(m, 8))
    if m8 >= 256:
        # 256 rows fully feeds the 256-wide (v6e/v7x) / 128-wide (v5e) MXU
        # while staying comfortable in VMEM (review: prefer 256 over 512).
        tm_cands = [256, 128, 64, 32, 16, 8]
    else:
        tm_cands = [m8] + [t for t in (128, 64, 32, 16, 8) if t < m8]
    th_cands = [hidden] + [c for c in (4096, 3072, 2048, 1536, 1024, 768,
                                       512, 384, 256, 128)
                           if c < hidden and hidden % c == 0]
    for tm in tm_cands:
        for th in th_cands:
            if _vmem_estimate(tm, th, hidden, d_in, d_out,
                              act_bytes, w_bytes) <= budget:
                return tm, th
    return tm_cands[-1], th_cands[-1]          # best effort


def feed_forward_pallas(x, w1, b1, w2, b2):
    """Fused MLP: GELU(x @ w1 + b1) @ w2 + b2.  Dropout layers are identity.

    w1: (d_in, hidden)  == torch linear1.weight.T
    w2: (hidden, d_out) == torch linear2.weight.T
    """
    *lead, d_in = x.shape
    hidden = w1.shape[1]
    d_out = w2.shape[1]
    m = 1
    for s in lead:
        m *= s

    act_bytes = x.dtype.itemsize
    w_bytes = w1.dtype.itemsize

    # Generation-aware VMEM budget: ~80% of physical capacity (v5e/v6e ~102 MiB,
    # v7x ~51 MiB), with extra headroom left for Mosaic internal scratch.
    cap = _vmem_capacity_bytes()
    usable = max(16 << 20, min(int(cap * 0.8), cap - (8 << 20)))
    tile_budget = int(usable * 0.85)

    tm, th = _select_tiles(m, d_in, hidden, d_out, act_bytes, w_bytes, tile_budget)

    # Pad flattened rows up to a multiple of tm so non-power-of-two token
    # counts (ViT's 197 tokens) still get full-width MXU tiles.
    x2 = x.reshape(m, d_in)
    m_pad = _round_up(m, tm)
    if m_pad != m:
        x2 = jnp.pad(x2, ((0, m_pad - m), (0, 0)))

    # Prefer >= 2 row steps so the v7x megacore ("parallel" axis) can give work
    # to both TensorCores; never drop below 128-row tiles.
    if m_pad // tm == 1 and tm >= 256:
        tm //= 2
        m_pad = _round_up(m, tm)

    b1_2d = b1.reshape(1, hidden)
    b2_2d = b2.reshape(1, d_out)

    grid = (m_pad // tm, hidden // th)
    resident = (th == hidden)   # weights fully VMEM-resident -> single buffer

    def _wspec(shape, imap, single):
        if single:
            return pl.BlockSpec(shape, imap, pipeline_mode=pl.Buffered(1))
        return pl.BlockSpec(shape, imap)

    # bf16 element-wise math when activations are bf16 (v6e/v7x bf16 VPU/EUP);
    # f32 otherwise.  MXU accumulation is always f32.
    elem_dtype = jnp.bfloat16 if x.dtype == jnp.bfloat16 else jnp.float32

    cost = pl.CostEstimate(
        flops=2 * m * (d_in * hidden + hidden * d_out),
        transcendentals=m * hidden,
        bytes_accessed=(act_bytes * m * (d_in + d_out)
                        + w_bytes * (d_in * hidden + hidden * d_out
                                     + hidden + d_out)),
    )

    out2 = pl.pallas_call(
        _make_ffn_kernel(elem_dtype),
        out_shape=jax.ShapeDtypeStruct((m_pad, d_out), x.dtype),
        grid=grid,
        in_specs=[
            pl.BlockSpec((tm, d_in), lambda i, k: (i, 0)),        # x row tile
            _wspec((d_in, th), lambda i, k: (0, k), resident),    # w1
            _wspec((1, th), lambda i, k: (0, k), resident),       # b1
            _wspec((th, d_out), lambda i, k: (k, 0), resident),   # w2
            _wspec((1, d_out), lambda i, k: (0, 0), True),        # b2
        ],
        out_specs=pl.BlockSpec((tm, d_out), lambda i, k: (i, 0)),
        scratch_shapes=[pltpu.VMEM((tm, d_out), jnp.float32)],
        compiler_params=pltpu.CompilerParams(
            dimension_semantics=("parallel", "arbitrary"),
            vmem_limit_bytes=int(usable),
        ),
        cost_estimate=cost,
    )(x2, w1, b1_2d, w2, b2_2d)

    if m_pad != m:
        out2 = out2[:m]
    return out2.reshape(*lead, d_out)


def _reference(x, w1, b1, w2, b2):
    # Pure-JAX reference (same tanh-GELU; Dropout is identity at p=0 / eval).
    d_in = x.shape[-1]
    x_flat = x.reshape(-1, d_in)
    h = jnp.dot(x_flat, w1, precision=jax.lax.Precision.HIGHEST) + b1
    h = 0.5 * h * (1.0 + jnp.tanh(math.sqrt(2.0 / math.pi)
                                  * (h + 0.044715 * h * h * h)))
    y = jnp.dot(h, w2, precision=jax.lax.Precision.HIGHEST) + b2
    return y.reshape(*x.shape[:-1], w2.shape[1])


if __name__ == "__main__":
    key = jax.random.PRNGKey(0)
    kx, k1, kb1, k2, kb2, kx2 = jax.random.split(key, 6)

    d_in, hidden, d_out = 32, 64, 32
    w1 = jax.random.normal(k1, (d_in, hidden), dtype=jnp.float32) * 0.05
    b1 = jax.random.normal(kb1, (hidden,), dtype=jnp.float32) * 0.05
    w2 = jax.random.normal(k2, (hidden, d_out), dtype=jnp.float32) * 0.05
    b2 = jax.random.normal(kb2, (d_out,), dtype=jnp.float32) * 0.05

    # Test 1: small, non-divisible token count (exercises row padding).
    B, N = 2, 9
    x = jax.random.normal(kx, (B, N, d_in), dtype=jnp.float32)
    out = jax.block_until_ready(feed_forward_pallas(x, w1, b1, w2, b2))
    ref = _reference(x, w1, b1, w2, b2)
    assert out.shape == (B, N, d_out)
    err = float(jnp.max(jnp.abs(out - ref)))
    assert jnp.allclose(out, ref, atol=2e-3, rtol=2e-3), f"max |err| = {err}"

    # Test 2: ViT-like 197 tokens (multi-row-step grid + padding to 256 tiles).
    B2, N2 = 2, 197
    x_big = jax.random.normal(kx2, (B2, N2, d_in), dtype=jnp.float32)
    out_big = jax.block_until_ready(feed_forward_pallas(x_big, w1, b1, w2, b2))
    ref_big = _reference(x_big, w1, b1, w2, b2)
    assert out_big.shape == (B2, N2, d_out)
    err_big = float(jnp.max(jnp.abs(out_big - ref_big)))
    assert jnp.allclose(out_big, ref_big, atol=2e-3, rtol=2e-3), \
        f"max |err| = {err_big}"

    print("KERNEL_OK")
</pallas_src>

<mosaic_0001>
module attributes {stable_mosaic.version = 11 : i64} {
  func.func @kernel(%arg0: i32, %arg1: i32, %arg2: memref<24x32xf32, #tpu.memory_space<vmem>>, %arg3: memref<32x64xf32, #tpu.memory_space<vmem>>, %arg4: memref<1x64xf32, #tpu.memory_space<vmem>>, %arg5: memref<64x32xf32, #tpu.memory_space<vmem>>, %arg6: memref<1x32xf32, #tpu.memory_space<vmem>>, %arg7: memref<24x32xf32, #tpu.memory_space<vmem>>, %arg8: memref<24x32xf32, #tpu.memory_space<vmem>>) attributes {dimension_semantics = [#tpu.dimension_semantics<parallel>, #tpu.dimension_semantics<arbitrary>], iteration_bounds = array<i64: 1, 1>, scalar_prefetch = 0 : i64, scratch_operands = 1 : i64, tpu.core_type = #tpu.core_type<tc>, window_params = [{transform_indices = @transform_0, window_bounds = array<i64: 24, 32>}, {pipeline_mode = #tpu.pipeline_mode<synchronous>, transform_indices = @transform_1, window_bounds = array<i64: 32, 64>}, {pipeline_mode = #tpu.pipeline_mode<synchronous>, transform_indices = @transform_2, window_bounds = array<i64: 1, 64>}, {pipeline_mode = #tpu.pipeline_mode<synchronous>, transform_indices = @transform_3, window_bounds = array<i64: 64, 32>}, {pipeline_mode = #tpu.pipeline_mode<synchronous>, transform_indices = @transform_4, window_bounds = array<i64: 1, 32>}, {transform_indices = @transform_5, window_bounds = array<i64: 24, 32>}]} {
    %c0_i32 = arith.constant 0 : i32
    %0 = arith.cmpi eq, %arg1, %c0_i32 : i32
    %1 = arith.extui %0 : i1 to i32
    %c0_i32_0 = arith.constant 0 : i32
    %2 = arith.cmpi ne, %1, %c0_i32_0 : i32
    scf.if %2 {
      %cst_19 = arith.constant 0.000000e+00 : f32
      %30 = vector.broadcast %cst_19 : f32 to vector<24x32xf32>
      %c0_20 = arith.constant 0 : index
      %c0_21 = arith.constant 0 : index
      %31 = vector.load %arg8[%c0_20, %c0_21] : memref<24x32xf32, #tpu.memory_space<vmem>>, vector<24x32xf32>
      tpu.vector_store %arg8[%c0_20, %c0_21], %30 {strides = array<i32>} : memref<24x32xf32, #tpu.memory_space<vmem>>, vector<24x32xf32>,
    } else {
    }
    %c0 = arith.constant 0 : index
    %c0_1 = arith.constant 0 : index
    %3 = vector.load %arg2[%c0, %c0_1] : memref<24x32xf32, #tpu.memory_space<vmem>>, vector<24x32xf32>
    %c0_2 = arith.constant 0 : index
    %c0_3 = arith.constant 0 : index
    %4 = vector.load %arg3[%c0_2, %c0_3] : memref<32x64xf32, #tpu.memory_space<vmem>>, vector<32x64xf32>
    %cst = arith.constant dense<0.000000e+00> : vector<24x64xf32>
    %5 = tpu.matmul %3, %4, %cst {dimension_numbers = #tpu.dot_dimension_numbers<[1], [0], [0], [1], [0, 0, 1, 1], [], []>} : vector<24x32xf32>, vector<32x64xf32>, vector<24x64xf32> -> vector<24x64xf32>
    %c0_4 = arith.constant 0 : index
    %c0_5 = arith.constant 0 : index
    %6 = vector.load %arg4[%c0_4, %c0_5] : memref<1x64xf32, #tpu.memory_space<vmem>>, vector<1x64xf32>
    %7 = vector.broadcast %6 : vector<1x64xf32> to vector<24x64xf32>
    %8 = arith.addf %5, %7 : vector<24x64xf32>
    %cst_6 = arith.constant 5.000000e-01 : f32
    %9 = vector.broadcast %cst_6 : f32 to vector<24x64xf32>
    %10 = arith.mulf %9, %8 : vector<24x64xf32>
    %cst_7 = arith.constant 4.471500e-02 : f32
    %11 = vector.broadcast %cst_7 : f32 to vector<24x64xf32>
    %12 = arith.mulf %11, %8 : vector<24x64xf32>
    %13 = arith.mulf %12, %8 : vector<24x64xf32>
    %14 = arith.mulf %13, %8 : vector<24x64xf32>
    %15 = arith.addf %8, %14 : vector<24x64xf32>
    %cst_8 = arith.constant 0.797884583 : f32
    %16 = vector.broadcast %cst_8 : f32 to vector<24x64xf32>
    %17 = arith.mulf %16, %15 : vector<24x64xf32>
    %18 = math.tanh %17 : vector<24x64xf32>
    %cst_9 = arith.constant 1.000000e+00 : f32
    %19 = vector.broadcast %cst_9 : f32 to vector<24x64xf32>
    %20 = arith.addf %19, %18 : vector<24x64xf32>
    %21 = arith.mulf %10, %20 : vector<24x64xf32>
    %c0_10 = arith.constant 0 : index
    %c0_11 = arith.constant 0 : index
    %22 = vector.load %arg8[%c0_10, %c0_11] : memref<24x32xf32, #tpu.memory_space<vmem>>, vector<24x32xf32>
    %c0_12 = arith.constant 0 : index
    %c0_13 = arith.constant 0 : index
    %23 = vector.load %arg5[%c0_12, %c0_13] : memref<64x32xf32, #tpu.memory_space<vmem>>, vector<64x32xf32>
    %cst_14 = arith.constant dense<0.000000e+00> : vector<24x32xf32>
    %24 = tpu.matmul %21, %23, %cst_14 {dimension_numbers = #tpu.dot_dimension_numbers<[1], [0], [0], [1], [0, 0, 1, 1], [], []>} : vector<24x64xf32>, vector<64x32xf32>, vector<24x32xf32> -> vector<24x32xf32>
    %25 = arith.addf %22, %24 : vector<24x32xf32>
    %c0_15 = arith.constant 0 : index
    %c0_16 = arith.constant 0 : index
    %26 = vector.load %arg8[%c0_15, %c0_16] : memref<24x32xf32, #tpu.memory_space<vmem>>, vector<24x32xf32>
    tpu.vector_store %arg8[%c0_15, %c0_16], %25 {strides = array<i32>} : memref<24x32xf32, #tpu.memory_space<vmem>>, vector<24x32xf32>,
    %c0_i32_17 = arith.constant 0 : i32
    %27 = arith.cmpi eq, %arg1, %c0_i32_17 : i32
    %28 = arith.extui %27 : i1 to i32
    %c0_i32_18 = arith.constant 0 : i32
    %29 = arith.cmpi ne, %28, %c0_i32_18 : i32
    scf.if %29 {
      %c0_19 = arith.constant 0 : index
      %c0_20 = arith.constant 0 : index
      %30 = vector.load %arg8[%c0_19, %c0_20] : memref<24x32xf32, #tpu.memory_space<vmem>>, vector<24x32xf32>
      %c0_21 = arith.constant 0 : index
      %c0_22 = arith.constant 0 : index
      %31 = vector.load %arg6[%c0_21, %c0_22] : memref<1x32xf32, #tpu.memory_space<vmem>>, vector<1x32xf32>
      %32 = vector.broadcast %31 : vector<1x32xf32> to vector<24x32xf32>
      %33 = arith.addf %30, %32 : vector<24x32xf32>
      %c0_23 = arith.constant 0 : index
      %c0_24 = arith.constant 0 : index
      %34 = vector.load %arg7[%c0_23, %c0_24] : memref<24x32xf32, #tpu.memory_space<vmem>>, vector<24x32xf32>
      tpu.vector_store %arg7[%c0_23, %c0_24], %33 {strides = array<i32>} : memref<24x32xf32, #tpu.memory_space<vmem>>, vector<24x32xf32>,
    } else {
    }
    return
  }
  func.func @transform_0(%arg0: i32, %arg1: i32) -> (i32, i32) {
    %c0_i32 = arith.constant 0 : i32
    %c0_i32_0 = arith.constant 0 : i32
    return %arg0, %c0_i32 : i32, i32
  }
  func.func @transform_1(%arg0: i32, %arg1: i32) -> (i32, i32) {
    %c0_i32 = arith.constant 0 : i32
    %c0_i32_0 = arith.constant 0 : i32
    return %c0_i32, %arg1 : i32, i32
  }
  func.func @transform_2(%arg0: i32, %arg1: i32) -> (i32, i32) {
    %c0_i32 = arith.constant 0 : i32
    %c0_i32_0 = arith.constant 0 : i32
    return %c0_i32, %arg1 : i32, i32
  }
  func.func @transform_3(%arg0: i32, %arg1: i32) -> (i32, i32) {
    %c0_i32 = arith.constant 0 : i32
    %c0_i32_0 = arith.constant 0 : i32
    return %arg1, %c0_i32 : i32, i32
  }
  func.func @transform_4(%arg0: i32, %arg1: i32) -> (i32, i32) {
    %c0_i32 = arith.constant 0 : i32
    %c0_i32_0 = arith.constant 0 : i32
    %c0_i32_1 = arith.constant 0 : i32
    return %c0_i32, %c0_i32_0 : i32, i32
  }
  func.func @transform_5(%arg0: i32, %arg1: i32) -> (i32, i32) {
    %c0_i32 = arith.constant 0 : i32
    %c0_i32_0 = arith.constant 0 : i32
    return %arg0, %c0_i32 : i32, i32
  }
}

</mosaic_0001>

<bundles_post_ra>
// kernel: tpu_custom_call.1
= control target key start
LH: loop header
LB: loop body
LE: loop exit
PB: predicated region body
PF: predicated region fallthrough
CT: control target
= control target key end

     0   :  { %vm25_vm0 = vcmask 261120   ;;  %v403_v1 = vmov 0.0   ;;  %vm404_vm1 = vmmov 0   ;;  %s531_s0 = inlined_call_operand.vmem [shape: f32[24,32], index: 0, kind: input, shape index: {}]   ;;  %s532_s1 = inlined_call_operand.vmem [shape: f32[32,64], index: 1, kind: input, shape index: {}]   ;;  %s533_s2 = inlined_call_operand.vmem [shape: f32[1,64], index: 2, kind: input, shape index: {}]   ;;  %s534_s3 = inlined_call_operand.vmem [shape: f32[64,32], index: 3, kind: input, shape index: {}]   ;;  %s535_s4 = inlined_call_operand.vmem [shape: f32[1,32], index: 4, kind: input, shape index: {}]   ;;  %s536_s5 = inlined_call_operand.hbm [shape: f32[24,32], index: 5, kind: output, shape index: {}]  }
   0x1   :  { %v35_v0 = vld [vmem:[%s532_s1 + $0x18] sm:$0xff]  ;;  %328 = vmatprep.subr.mxu0 %v403_v1  ;;  %v34_v2 = vld [vmem:[%s532_s1 + $0x10] sm:$0xff]  ;;  %336 = vmatprep.mubr.msk.f32.mxu0 %vm404_vm1, %v403_v1  ;;  %26 = vst.msk [vmem:[#allocation2] sm:$0xff] %vm25_vm0, %v403_v1  ;;  %27 = vst.msk [vmem:[#allocation2 + $0x8] sm:$0xff] %vm25_vm0, %v403_v1 }
   0x2   :  { %28 = vst.msk [vmem:[#allocation2 + $0x10] sm:$0xff] %vm25_vm0, %v403_v1  ;;  %329 = vmatpush3.msra.mxu0 %v35_v0  ;;  %345 = vmatprep.subr.mxu1 %v403_v1 }
   0x3   :  { %10 = vsyncpa [#allocation4], 0  ;;  %330 = vmatprep.subr.mxu0 %v403_v1  ;;  %v33_v3 = vld [vmem:[%s532_s1 + $0x8] sm:$0xff]  ;;  %361 = vmatprep.mubr.msk.f32.mxu1 %vm404_vm1, %v403_v1  ;;  %v32_v4 = vld [vmem:[%s532_s1] sm:$0xff]  ;;  %vm171_vm2 = vcmask 523264   ;;  %s405_s23 = smov [#allocation3]  }
   0x4   :  { %331 = vmatpush3.msra.mxu0 %v34_v2  ;;  %v29_v5 = vld [vmem:[%s531_s0] sm:$0xff]  ;;  %v30_v6 = vld [vmem:[%s531_s0 + $0x8] sm:$0xff]  ;;  %v31_v7 = vld [vmem:[%s531_s0 + $0x10] sm:$0xff]  ;;  %s291_s24 = sshll.u32 %s405_s23, 4  ;;  %s292_s24 = int_to_ptr.vmem [resolvable:$true] %s291_s24 }
   0x5   :  { %332 = vmatprep.subr.mxu0 %v403_v1  ;;  %v170_v8 = vld [vmem:[%s534_s3 + $0x38] sm:$0xff]  ;;  %v169_v9 = vld [vmem:[%s534_s3 + $0x30] sm:$0xff]  ;;  %v168_v10 = vld [vmem:[%s534_s3 + $0x28] sm:$0xff]  ;;  %p386_p1 = scmp.lt.s32.totalorder %s292_s24, %s292_s24 }
   0x6   :  { %333 = vmatpush3.msra.mxu0 %v33_v3  ;;  %346 = vmatpush3.msra.mxu1 %v170_v8  ;;  %v167_v11 = vld [vmem:[%s534_s3 + $0x20] sm:$0xff]  ;;  %v166_v12 = vld [vmem:[%s534_s3 + $0x18] sm:$0xff]  ;;  %v165_v13 = vld [vmem:[%s534_s3 + $0x10] sm:$0xff] }
   0x7   :  { %334 = vmatprep.subr.mxu0 %v403_v1  ;;  %347 = vmatprep.subr.mxu1 %v403_v1  ;;  %v164_v14 = vld [vmem:[%s534_s3 + $0x8] sm:$0xff]  ;;  %v163_v15 = vld [vmem:[%s534_s3] sm:$0xff] }
   0x8   :  { %335 = vmatpush3.msra.mxu0 %v32_v4  ;;  %348 = vmatpush3.msra.mxu1 %v169_v9  ;;  %v302_v16 = vld [vmem:[%s533_s2] ss:$0 sm:$0xff]  ;;  %v161_v57 = vld [vmem:[#allocation2 + $0x8] sm:$0xff] }
   0x9   :  { %337 = vmatmul.mubr.msk.f32.vlgmr.msra.gmra.mxu0 %vm25_vm0, %v29_v5  ;;  %349 = vmatprep.subr.mxu1 %v403_v1  ;;  %v160_v53 = vld [vmem:[#allocation2] sm:$0xff]  ;;  %v162_v61 = vld [vmem:[#allocation2 + $0x10] sm:$0xff] }
   0xa   :  { %339 = vmatprep.mubr.msk.f32.mxu0 %vm404_vm1, %v403_v1  ;;  %350 = vmatpush3.msra.mxu1 %v168_v10  ;;  %v309_v63 = vld [vmem:[%s535_s4] ss:$0 sm:$0xff]  ;;  %s381_s4 = scalar_lea.vmem %s292_s24, 384 }
   0xb   :  { %351 = vmatprep.subr.mxu1 %v403_v1  ;;  %p382_p0 = scmp.ne.s32.totalorder %s292_s24, %s381_s4  ;;  %p387_p2 = scmp.lt.s32.totalorder %s381_s4, %s381_s4 }
   0xc   :  { %352 = vmatpush3.msra.mxu1 %v167_v11 }
   0xd   :  { %340 = vmatmul.mubr.msk.f32.gmra.mxu0 %vm25_vm0, %v30_v6  ;;  %353 = vmatprep.subr.mxu1 %v403_v1  ;;  %p388_p3 = por %p387_p2, %p386_p1 }
   0xe   :  { %342 = vmatprep.mubr.msk.f32.mxu0 %vm404_vm1, %v403_v1  ;;  %354 = vmatpush3.msra.mxu1 %v166_v12 }
   0xf   :  { %355 = vmatprep.subr.mxu1 %v403_v1  ;;  %p389_p4 = pnand %p388_p3, %p382_p0 }
  0x10   :  { %356 = vmatpush3.msra.mxu1 %v165_v13 }
  0x11   :  { %343 = vmatmul.mubr.msk.f32.gmra.mxu0 %vm25_vm0, %v31_v7  ;;  %357 = vmatprep.subr.mxu1 %v403_v1 }
  0x12   :  { %358 = vmatpush3.msra.mxu1 %v164_v14 }
  0x13   :  { %359 = vmatprep.subr.mxu1 %v403_v1 }
  0x14   :  { %360 = vmatpush3.msra.mxu1 %v163_v15 }
  0xc9   :  { %v119_v17 = vpop.f32.mrf.mxu0 }
  0xca   :  { %v120_v18 = vadd.f32 %v302_v16, %v119_v17 }
  0xcb   :  { %v338_v19 = vpop.f32.mrf.mxu0 }
  0xcc   :  { %v136_v20 = vmul.f32 0.044715, %v120_v18  ;;  %v133_v42 = vmul.f32 0.5, %v120_v18 }
  0xcd   :  { %v124_v21 = vpop.f32.mrf.mxu0 }
  0xce   :  { %v139_v22 = vmul.f32 %v136_v20, %v120_v18  ;;  %v125_v23 = vadd.f32 %v302_v16, %v124_v21 }
  0xcf   :  { %v341_v24 = vpop.f32.mrf.mxu0 }
  0xd0   :  { %v142_v25 = vmul.f32 %v139_v22, %v120_v18  ;;  %v137_v26 = vmul.f32 0.044715, %v125_v23  ;;  %v134_v46 = vmul.f32 0.5, %v125_v23 }
  0xd1   :  { %v129_v27 = vpop.f32.mrf.mxu0 }
  0xd2   :  { %v145_v28 = vadd.f32 %v142_v25, %v120_v18  ;;  %v140_v29 = vmul.f32 %v137_v26, %v125_v23  ;;  %v130_v30 = vadd.f32 %v302_v16, %v129_v27 }
  0xd3   :  { %v344_v31 = vpop.f32.mrf.mxu0 }
  0xd4   :  { %v143_v32 = vmul.f32 %v140_v29, %v125_v23  ;;  %v138_v33 = vmul.f32 0.044715, %v130_v30  ;;  %v148_v34 = vmul.f32 0.7978846, %v145_v28  ;;  %v135_v50 = vmul.f32 0.5, %v130_v30 }
  0xd6   :  { %v146_v35 = vadd.f32 %v143_v32, %v125_v23  ;;  %v141_v36 = vmul.f32 %v138_v33, %v130_v30  ;;  %375 = vtanh.f32 %v148_v34 }
  0xd8   :  { %v144_v37 = vmul.f32 %v141_v36, %v130_v30  ;;  %v149_v38 = vmul.f32 0.7978846, %v146_v35 }
  0xda   :  { %v147_v39 = vadd.f32 %v144_v37, %v130_v30  ;;  %377 = vtanh.f32 %v149_v38 }
  0xdc   :  { %v150_v40 = vmul.f32 0.7978846, %v147_v39 }
  0xde   :  { %379 = vtanh.f32 %v150_v40 }
  0xe3   :  { %v376_v41 = vpop.eup %375 }
  0xe4   :  { %v154_v43 = vadd.f32 1.0, %v376_v41 }
  0xe6   :  { %v157_v44 = vmul.f32 %v154_v43, %v133_v42 }
  0xe7   :  { %v378_v45 = vpop.eup %377 }
  0xe8   :  { %362 = vmatmul.mubr.msk.f32.vlgmr.msra.gmra.mxu1 %vm171_vm2, %v157_v44  ;;  %v155_v47 = vadd.f32 1.0, %v378_v45 }
  0xe9   :  { %364 = vmatprep.mubr.msk.f32.mxu1 %vm404_vm1, %v403_v1 }
  0xea   :  { %v158_v48 = vmul.f32 %v155_v47, %v134_v46 }
  0xeb   :  { %v380_v49 = vpop.eup %379 }
  0xec   :  { %365 = vmatmul.mubr.msk.f32.gmra.mxu1 %vm171_vm2, %v158_v48  ;;  %v156_v51 = vadd.f32 1.0, %v380_v49 }
  0xed   :  { %367 = vmatprep.mubr.msk.f32.mxu1 %vm404_vm1, %v403_v1 }
  0xee   :  { %v159_v52 = vmul.f32 %v156_v51, %v135_v50 }
  0xf0   :  { %368 = vmatmul.mubr.msk.f32.gmra.mxu1 %vm171_vm2, %v159_v52 }
 0x1a8   :  { %v247_v54 = vpop.f32.mrf.mxu1 }
 0x1a9   :  { %v261_v55 = vadd.f32 %v247_v54, %v160_v53 }
 0x1aa   :  { %v363_v56 = vpop.f32.mrf.mxu1 }
 0x1ab   :  { %264 = vst.msk [vmem:[#allocation2] sm:$0xff] %vm25_vm0, %v261_v55 }
 0x1ac   :  { %v252_v58 = vpop.f32.mrf.mxu1 }
 0x1ad   :  { %v262_v59 = vadd.f32 %v252_v58, %v161_v57 }
 0x1ae   :  { %v366_v60 = vpop.f32.mrf.mxu1 }
 0x1af   :  { %265 = vst.msk [vmem:[#allocation2 + $0x8] sm:$0xff] %vm25_vm0, %v262_v59 }
 0x1b0   :  { %v257_v62 = vpop.f32.mrf.mxu1 }
 0x1b1   :  { %v263_v0 = vadd.f32 %v257_v62, %v162_v61 }
 0x1b2   :  { %v369_v1 = vpop.f32.mrf.mxu1  ;;  %v270_v2 = vld [vmem:[#allocation2] sm:$0xff] }
 0x1b3   :  { %266 = vst.msk [vmem:[#allocation2 + $0x10] sm:$0xff] %vm25_vm0, %v263_v0  ;;  %v280_v3 = vadd.f32 %v309_v63, %v270_v2 }
 0x1b5   :  { %283 = vst.msk [vmem:[#allocation3] sm:$0xff] %vm25_vm0, %v280_v3 }
 0x1b6   :  { %v271_v4 = vld [vmem:[#allocation2 + $0x8] sm:$0xff] }
 0x1b7   :  { %v281_v5 = vadd.f32 %v309_v63, %v271_v4 }
 0x1b9   :  { %284 = vst.msk [vmem:[#allocation3 + $0x8] sm:$0xff] %vm25_vm0, %v281_v5 }
 0x1ba   :  { %v272_v6 = vld [vmem:[#allocation2 + $0x10] sm:$0xff] }
 0x1bb   :  { %v282_v7 = vadd.f32 %v309_v63, %v272_v6 }
 0x1bd   :  { %285 = vst.msk [vmem:[#allocation3 + $0x10] sm:$0xff] %vm25_vm0, %v282_v7 }
 0x1be   :  { %392 = shalt.err (!%p389_p4)
}
 0x1bf   :  { %s406_s25 = smov 128   ;;  %s407_s26 = smov 8  }
 0x1c0   :  { %297 = dma.vmem_to_hbm [thread:$0]  %s292_s24, 384, %s536_s5, [#allocation4], %s406_s25, %s406_s25, %s407_s26  }
 0x1c1   :  { %401 = dma.done.wait [#allocation4], 384  }
 0x1c2   :  { %402 = vsyncadd [#allocation4], 4294966912 }
 0x1c3   :  { %301 = vsyncpa [#allocation4], 1 }

</bundles_post_ra>
